<compile_context>
chip_gen: v7x
topology: tpu7x:2x2x1
jax: 0.10.0
libtpu: 0.0.40
codegen_flags: <defaults>
</compile_context>

<pallas_src>
import functools

import jax
import jax.numpy as jnp
from jax.experimental import pallas as pl
from jax.experimental.pallas import tpu as pltpu

LN_EPS = 1e-5  # torch.nn.LayerNorm default eps


def _round_up(n, m):
    return ((n + m - 1) // m) * m


def _sublayer_connection_kernel(seed_ref, x_ref, w_ref, b_ref, g_ref, be_ref,
                                o_ref, *, add_first, dropout_p, training, eps,
                                tm):
    x_nat = x_ref[...]                       # native dtype -> feeds MXU directly
    x = x_nat.astype(jnp.float32)            # residual / LN math in f32
    gamma = g_ref[...].astype(jnp.float32)   # (1, D), broadcasts over rows
    beta = be_ref[...].astype(jnp.float32)   # (1, D)

    def layer_norm(v):
        mu = jnp.mean(v, axis=-1, keepdims=True)
        var = jnp.mean(jnp.square(v - mu), axis=-1, keepdims=True)
        return (v - mu) * jax.lax.rsqrt(var + eps) * gamma + beta

    def sublayer(v_nat):
        # synthetic sublayer f: dense projection on the MXU, f32 accumulation
        return jnp.dot(v_nat, w_ref[...],
                       preferred_element_type=jnp.float32) \
               + b_ref[...].astype(jnp.float32)

    def dropout(v):
        if (not training) or dropout_p == 0.0:
            return v                         # nn.Dropout eval == identity
        # TODO(synk): portable hash-based PRNG; not bit-exact with torch RNG.
        rows = (jax.lax.broadcasted_iota(jnp.int32, v.shape, 0)
                + pl.program_id(0) * tm).astype(jnp.uint32)
        cols = jax.lax.broadcasted_iota(jnp.int32, v.shape, 1).astype(jnp.uint32)
        h = rows * jnp.uint32(2654435761) ^ (cols * jnp.uint32(2246822519))
        h = h + seed_ref[0].astype(jnp.uint32)
        h = h ^ (h >> 15)
        h = h * jnp.uint32(3266489917)
        h = h ^ (h >> 13)
        h = h * jnp.uint32(668265263)
        h = h ^ (h >> 16)
        u = (h >> 8).astype(jnp.float32) * (1.0 / float(1 << 24))
        # single select (no extra cast/multiply); 1/(1-p) folded as a constant
        return jnp.where(u >= dropout_p, v * (1.0 / (1.0 - dropout_p)), 0.0)

    if add_first:
        res = layer_norm(dropout(sublayer(x_nat)) + x)            # LN(f(x)+x)
    else:
        res = dropout(sublayer(layer_norm(x).astype(x_nat.dtype))) + x  # f(LN(x))+x
    o_ref[...] = res.astype(o_ref.dtype)


def sublayer_connection(x, w, b, gamma, beta, *, add_first=True,
                        dropout_p=0.1, training=False, seed=0, eps=LN_EPS,
                        row_tile=256):
    orig_shape = x.shape
    D = orig_shape[-1]
    x2 = x.reshape(-1, D)
    R = x2.shape[0]

    # Row tile: multiple of 8 (f32 sublane), capped at row_tile (~256 fills the
    # v6e/v7x MXU; still fine on v5e).  Pad rows so pl.cdiv tiling is exact --
    # padded (zero) rows are computed harmlessly and sliced off afterwards.
    tm = min(int(row_tile), _round_up(R, 8))
    R_pad = _round_up(R, tm)
    if R_pad != R:
        x2 = jnp.pad(x2, ((0, R_pad - R), (0, 0)))

    seed_arr = jnp.array([seed], dtype=jnp.int32)
    b2 = b.reshape(1, D)
    g2 = gamma.reshape(1, D)
    be2 = beta.reshape(1, D)

    kernel = functools.partial(
        _sublayer_connection_kernel,
        add_first=bool(add_first), dropout_p=float(dropout_p),
        training=bool(training), eps=float(eps), tm=tm)

    x_bytes = jnp.dtype(x.dtype).itemsize
    cost = pl.CostEstimate(
        flops=2 * R_pad * D * D,
        transcendentals=R_pad,                      # rsqrt per row
        bytes_accessed=(2 * R_pad * D * x_bytes     # x in + out
                        + D * D * jnp.dtype(w.dtype).itemsize
                        + 3 * D * 4))

    out = pl.pallas_call(
        kernel,
        out_shape=jax.ShapeDtypeStruct((R_pad, D), x.dtype),
        grid_spec=pltpu.PrefetchScalarGridSpec(
            num_scalar_prefetch=1,                    # dropout seed -> SMEM
            grid=(pl.cdiv(R_pad, tm),),
            in_specs=[
                pl.BlockSpec((tm, D), lambda i, s: (i, 0)),   # x row tile
                pl.BlockSpec((D, D),  lambda i, s: (0, 0)),   # W (resident)
                pl.BlockSpec((1, D),  lambda i, s: (0, 0)),   # b
                pl.BlockSpec((1, D),  lambda i, s: (0, 0)),   # LN gamma
                pl.BlockSpec((1, D),  lambda i, s: (0, 0)),   # LN beta
            ],
            out_specs=pl.BlockSpec((tm, D), lambda i, s: (i, 0)),
        ),
        compiler_params=pltpu.CompilerParams(
            dimension_semantics=("parallel",),        # rows independent -> 2 TCs on v7x
            vmem_limit_bytes=64 * 1024 * 1024),
        cost_estimate=cost,
    )(seed_arr, x2, w, b2, g2, be2)

    return out[:R].reshape(orig_shape)


def _reference(x, w, b, gamma, beta, *, add_first, eps=LN_EPS):
    def ln(v):
        mu = v.mean(-1, keepdims=True)
        var = ((v - mu) ** 2).mean(-1, keepdims=True)
        return (v - mu) / jnp.sqrt(var + eps) * gamma + beta

    f = lambda v: v @ w + b
    if add_first:
        return ln(f(x) + x)
    return f(ln(x)) + x


if __name__ == "__main__":
    B, S, D = 2, 8, 128                              # batch, seq, hidden (=size)
    key = jax.random.PRNGKey(0)
    kx, kw, kb, kg, kbe = jax.random.split(key, 5)
    x = jax.random.normal(kx, (B, S, D), dtype=jnp.float32)
    # deterministic synthetic parameters (sublayer weight/bias + LayerNorm affine)
    w = jax.random.normal(kw, (D, D), dtype=jnp.float32) * 0.05
    b = jax.random.normal(kb, (D,), dtype=jnp.float32) * 0.01
    gamma = 1.0 + 0.1 * jax.random.normal(kg, (D,), dtype=jnp.float32)
    beta = 0.1 * jax.random.normal(kbe, (D,), dtype=jnp.float32)

    ok = True
    for add_first in (True, False):
        out = sublayer_connection(x, w, b, gamma, beta,
                                  add_first=add_first, training=False)
        out = jax.block_until_ready(out)
        ref = _reference(x, w, b, gamma, beta, add_first=add_first)
        ok &= bool(jnp.allclose(out, ref, atol=1e-4, rtol=1e-4))

    # Exercise the in-kernel dropout (training) path once as well.
    out_train = sublayer_connection(x, w, b, gamma, beta, add_first=True,
                                    training=True, seed=123)
    out_train = jax.block_until_ready(out_train)
    ok &= bool(jnp.all(jnp.isfinite(out_train)))

    if ok:
        print("KERNEL_OK")
    else:
        print("KERNEL_MISMATCH")
</pallas_src>

<mosaic_0001>
module attributes {stable_mosaic.version = 11 : i64} {
  func.func @_sublayer_connection_kernel(%arg0: i32, %arg1: memref<1xi32, #tpu.memory_space<smem>>, %arg2: memref<16x128xf32, #tpu.memory_space<vmem>>, %arg3: memref<128x128xf32, #tpu.memory_space<vmem>>, %arg4: memref<1x128xf32, #tpu.memory_space<vmem>>, %arg5: memref<1x128xf32, #tpu.memory_space<vmem>>, %arg6: memref<1x128xf32, #tpu.memory_space<vmem>>, %arg7: memref<16x128xf32, #tpu.memory_space<vmem>>) attributes {dimension_semantics = [#tpu.dimension_semantics<parallel>], iteration_bounds = array<i64: 1>, scalar_prefetch = 1 : i64, scratch_operands = 0 : i64, tpu.core_type = #tpu.core_type<tc>, window_params = [{transform_indices = @transform_0, window_bounds = array<i64: 16, 128>}, {pipeline_mode = #tpu.pipeline_mode<synchronous>, transform_indices = @transform_1, window_bounds = array<i64: 128, 128>}, {pipeline_mode = #tpu.pipeline_mode<synchronous>, transform_indices = @transform_2, window_bounds = array<i64: 1, 128>}, {pipeline_mode = #tpu.pipeline_mode<synchronous>, transform_indices = @transform_3, window_bounds = array<i64: 1, 128>}, {pipeline_mode = #tpu.pipeline_mode<synchronous>, transform_indices = @transform_4, window_bounds = array<i64: 1, 128>}, {transform_indices = @transform_5, window_bounds = array<i64: 16, 128>}]} {
    %c0 = arith.constant 0 : index
    %c0_0 = arith.constant 0 : index
    %0 = vector.load %arg2[%c0, %c0_0] : memref<16x128xf32, #tpu.memory_space<vmem>>, vector<16x128xf32>
    %c0_1 = arith.constant 0 : index
    %c0_2 = arith.constant 0 : index
    %1 = vector.load %arg5[%c0_1, %c0_2] : memref<1x128xf32, #tpu.memory_space<vmem>>, vector<1x128xf32>
    %c0_3 = arith.constant 0 : index
    %c0_4 = arith.constant 0 : index
    %2 = vector.load %arg6[%c0_3, %c0_4] : memref<1x128xf32, #tpu.memory_space<vmem>>, vector<1x128xf32>
    %c0_5 = arith.constant 0 : index
    %c0_6 = arith.constant 0 : index
    %3 = vector.load %arg3[%c0_5, %c0_6] : memref<128x128xf32, #tpu.memory_space<vmem>>, vector<128x128xf32>
    %cst = arith.constant dense<0.000000e+00> : vector<16x128xf32>
    %4 = tpu.matmul %0, %3, %cst {dimension_numbers = #tpu.dot_dimension_numbers<[1], [0], [0], [1], [0, 0, 1, 1], [], []>} : vector<16x128xf32>, vector<128x128xf32>, vector<16x128xf32> -> vector<16x128xf32>
    %c0_7 = arith.constant 0 : index
    %c0_8 = arith.constant 0 : index
    %5 = vector.load %arg4[%c0_7, %c0_8] : memref<1x128xf32, #tpu.memory_space<vmem>>, vector<1x128xf32>
    %6 = vector.broadcast %5 : vector<1x128xf32> to vector<16x128xf32>
    %7 = arith.addf %4, %6 : vector<16x128xf32>
    %8 = arith.addf %7, %0 : vector<16x128xf32>
    %cst_9 = arith.constant dense<0.000000e+00> : vector<16xf32>
    %9 = vector.multi_reduction <add>, %8, %cst_9 [1] : vector<16x128xf32> to vector<16xf32>
    %10 = vector.shape_cast %9 : vector<16xf32> to vector<16x1xf32>
    %cst_10 = arith.constant 1.280000e+02 : f32
    %11 = vector.broadcast %cst_10 : f32 to vector<16x1xf32>
    %12 = arith.divf %10, %11 : vector<16x1xf32>
    %13 = vector.broadcast %12 : vector<16x1xf32> to vector<16x128xf32>
    %14 = arith.subf %8, %13 : vector<16x128xf32>
    %15 = arith.mulf %14, %14 : vector<16x128xf32>
    %cst_11 = arith.constant dense<0.000000e+00> : vector<16xf32>
    %16 = vector.multi_reduction <add>, %15, %cst_11 [1] : vector<16x128xf32> to vector<16xf32>
    %17 = vector.shape_cast %16 : vector<16xf32> to vector<16x1xf32>
    %cst_12 = arith.constant 1.280000e+02 : f32
    %18 = vector.broadcast %cst_12 : f32 to vector<16x1xf32>
    %19 = arith.divf %17, %18 : vector<16x1xf32>
    %20 = vector.broadcast %12 : vector<16x1xf32> to vector<16x128xf32>
    %21 = arith.subf %8, %20 : vector<16x128xf32>
    %cst_13 = arith.constant 9.99999974E-6 : f32
    %22 = vector.broadcast %cst_13 : f32 to vector<16x1xf32>
    %23 = arith.addf %19, %22 : vector<16x1xf32>
    %24 = math.rsqrt %23 : vector<16x1xf32>
    %25 = vector.broadcast %24 : vector<16x1xf32> to vector<16x128xf32>
    %26 = arith.mulf %21, %25 : vector<16x128xf32>
    %27 = vector.broadcast %1 : vector<1x128xf32> to vector<16x128xf32>
    %28 = arith.mulf %26, %27 : vector<16x128xf32>
    %29 = vector.broadcast %2 : vector<1x128xf32> to vector<16x128xf32>
    %30 = arith.addf %28, %29 : vector<16x128xf32>
    %c0_14 = arith.constant 0 : index
    %c0_15 = arith.constant 0 : index
    %31 = vector.load %arg7[%c0_14, %c0_15] : memref<16x128xf32, #tpu.memory_space<vmem>>, vector<16x128xf32>
    tpu.vector_store %arg7[%c0_14, %c0_15], %30 {strides = array<i32>} : memref<16x128xf32, #tpu.memory_space<vmem>>, vector<16x128xf32>,
    return
  }
  func.func @transform_0(%arg0: i32, %arg1: memref<1xi32, #tpu.memory_space<smem>>) -> (i32, i32) {
    %c0_i32 = arith.constant 0 : i32
    %c0_i32_0 = arith.constant 0 : i32
    return %arg0, %c0_i32 : i32, i32
  }
  func.func @transform_1(%arg0: i32, %arg1: memref<1xi32, #tpu.memory_space<smem>>) -> (i32, i32) {
    %c0_i32 = arith.constant 0 : i32
    %c0_i32_0 = arith.constant 0 : i32
    %c0_i32_1 = arith.constant 0 : i32
    return %c0_i32, %c0_i32_0 : i32, i32
  }
  func.func @transform_2(%arg0: i32, %arg1: memref<1xi32, #tpu.memory_space<smem>>) -> (i32, i32) {
    %c0_i32 = arith.constant 0 : i32
    %c0_i32_0 = arith.constant 0 : i32
    %c0_i32_1 = arith.constant 0 : i32
    return %c0_i32, %c0_i32_0 : i32, i32
  }
  func.func @transform_3(%arg0: i32, %arg1: memref<1xi32, #tpu.memory_space<smem>>) -> (i32, i32) {
    %c0_i32 = arith.constant 0 : i32
    %c0_i32_0 = arith.constant 0 : i32
    %c0_i32_1 = arith.constant 0 : i32
    return %c0_i32, %c0_i32_0 : i32, i32
  }
  func.func @transform_4(%arg0: i32, %arg1: memref<1xi32, #tpu.memory_space<smem>>) -> (i32, i32) {
    %c0_i32 = arith.constant 0 : i32
    %c0_i32_0 = arith.constant 0 : i32
    %c0_i32_1 = arith.constant 0 : i32
    return %c0_i32, %c0_i32_0 : i32, i32
  }
  func.func @transform_5(%arg0: i32, %arg1: memref<1xi32, #tpu.memory_space<smem>>) -> (i32, i32) {
    %c0_i32 = arith.constant 0 : i32
    %c0_i32_0 = arith.constant 0 : i32
    return %arg0, %c0_i32 : i32, i32
  }
}

</mosaic_0001>

<bundles_post_ra>
// kernel: tpu_custom_call.1
= control target key start
LH: loop header
LB: loop body
LE: loop exit
PB: predicated region body
PF: predicated region fallthrough
CT: control target
= control target key end

     0   :  { %12 = vsyncpa [#allocation5], 0  ;;  %s621_s0 = inlined_call_operand.<no memory space> [shape: s32[1], index: 0, kind: input, shape index: {}]   ;;  %s622_s1 = inlined_call_operand.hbm [shape: f32[16,128], index: 1, kind: input, shape index: {}]   ;;  %s623_s2 = inlined_call_operand.hbm [shape: f32[128,128], index: 2, kind: input, shape index: {}]   ;;  %s624_s3 = inlined_call_operand.hbm [shape: f32[1,128], index: 3, kind: input, shape index: {}]   ;;  %s625_s4 = inlined_call_operand.hbm [shape: f32[1,128], index: 4, kind: input, shape index: {}]   ;;  %s626_s5 = inlined_call_operand.hbm [shape: f32[1,128], index: 5, kind: input, shape index: {}]   ;;  %s627_s6 = inlined_call_operand.hbm [shape: f32[16,128], index: 6, kind: output, shape index: {}]  }
   0x1   :  { %13 = vsyncpa [#allocation8], 0 }
   0x2   :  { %14 = vsyncpa [#allocation11], 0 }
   0x3   :  { %15 = vsyncpa [#allocation6], 0  ;;  %s489_s0 = smov [#allocation7]   ;;  %s490_s22 = smov [#allocation10]  }
   0x4   :  { %s33_s21 = sshll.u32 %s489_s0, 4  ;;  %s56_s23 = sshll.u32 %s490_s22, 4  ;;  %s34_s21 = int_to_ptr.vmem [resolvable:$true] %s33_s21  ;;  %s532_s23 = int_to_ptr.vmem [resolvable:$true] %s56_s23 }
   0x5   :  { %s349_s26 = scalar_lea.hbm %s623_s2, 2048 }
   0x6   :  { %p350_p0 = scmp.ne.s32.totalorder %s623_s2, %s349_s26  ;;  %p353_p1 = scmp.lt.u32.totalorder %s349_s26, %s623_s2 }
   0x8   :  { %p355_p2 = pnand %p353_p1, %p350_p0 }
   0xa   :  { %358 = shalt.err (!%p355_p2)
}
   0xb   :  { %s359_s7 = scalar_lea.vmem %s34_s21, 2048  ;;  %p364_p4 = scmp.lt.s32.totalorder %s34_s21, %s34_s21 }
   0xc   :  { %p360_p3 = scmp.ne.s32.totalorder %s34_s21, %s359_s7  ;;  %p365_p5 = scmp.lt.s32.totalorder %s359_s7, %s359_s7 }
   0xe   :  { %p366_p6 = por %p365_p5, %p364_p4 }
  0x10   :  { %p367_p7 = pnand %p366_p6, %p360_p3 }
  0x12   :  { %370 = shalt.err (!%p367_p7)
}
  0x13   :  { %s491_s8 = smov 128   ;;  %s492_s9 = smov 8  }
  0x14   :  { %39 = dma.hbm_to_vmem [thread:$0]  %s623_s2, 2048, %s34_s21, [#allocation8], %s491_s8, %s491_s8, %s492_s9  }
  0x15   :  { %s371_s14 = scalar_lea.hbm %s625_s4, 16 }
  0x16   :  { %p372_p8 = scmp.ne.s32.totalorder %s625_s4, %s371_s14  ;;  %p375_p9 = scmp.lt.u32.totalorder %s371_s14, %s625_s4 }
  0x18   :  { %p377_p10 = pnand %p375_p9, %p372_p8 }
  0x1a   :  { %380 = shalt.err (!%p377_p10)
}
  0x1b   :  { %s381_s19 = scalar_lea.vmem %s532_s23, 16  ;;  %s385_s2 = scalar_lea.vmem %s532_s23, 32 }
  0x1c   :  { %p382_p11 = scmp.ne.s32.totalorder %s532_s23, %s381_s19  ;;  %p386_p12 = scmp.lt.s32.totalorder %s532_s23, %s532_s23 }
  0x1d   :  { %p387_p13 = scmp.lt.s32.totalorder %s385_s2, %s381_s19 }
  0x1f   :  { %p388_p0 = por %p387_p13, %p386_p12 }
  0x21   :  { %p389_p1 = pnand %p388_p0, %p382_p11 }
  0x23   :  { %392 = shalt.err (!%p389_p1)
}
  0x24   :  { %59 = dma.hbm_to_vmem [thread:$0]  %s625_s4, 16, %s532_s23, [#allocation11]  }
  0x25   :  { %s493_s21 = smov [#allocation4]   ;;  %s494_s24 = smov [#allocation9]  }
  0x26   :  { %s21_s22 = sshll.u32 %s493_s21, 4  ;;  %s46_s25 = sshll.u32 %s494_s24, 4  ;;  %s22_s22 = int_to_ptr.vmem [resolvable:$true] %s21_s22  ;;  %s47_s25 = int_to_ptr.vmem [resolvable:$true] %s46_s25 }
  0x27   :  { %s393_s28 = scalar_lea.hbm %s622_s1, 256 }
  0x28   :  { %p394_p2 = scmp.ne.s32.totalorder %s622_s1, %s393_s28  ;;  %p397_p3 = scmp.lt.u32.totalorder %s393_s28, %s622_s1 }
  0x2a   :  { %p399_p4 = pnand %p397_p3, %p394_p2 }
  0x2c   :  { %402 = shalt.err (!%p399_p4)
}
  0x2d   :  { %s403_s4 = scalar_lea.vmem %s22_s22, 256  ;;  %p408_p6 = scmp.lt.s32.totalorder %s22_s22, %s22_s22 }
  0x2e   :  { %p404_p5 = scmp.ne.s32.totalorder %s22_s22, %s403_s4  ;;  %p409_p7 = scmp.lt.s32.totalorder %s403_s4, %s403_s4 }
  0x30   :  { %p410_p8 = por %p409_p7, %p408_p6 }
  0x32   :  { %p411_p9 = pnand %p410_p8, %p404_p5 }
  0x34   :  { %414 = shalt.err (!%p411_p9)
}
  0x35   :  { %27 = dma.hbm_to_vmem [thread:$0]  %s622_s1, 256, %s22_s22, [#allocation5], %s491_s8, %s491_s8, %s492_s9  }
  0x36   :  { %s415_s14 = scalar_lea.hbm %s624_s3, 16 }
  0x37   :  { %p416_p10 = scmp.ne.s32.totalorder %s624_s3, %s415_s14  ;;  %p419_p11 = scmp.lt.u32.totalorder %s415_s14, %s624_s3 }
  0x39   :  { %p421_p12 = pnand %p419_p11, %p416_p10 }
  0x3b   :  { %424 = shalt.err (!%p421_p12)
}
  0x3c   :  { %s425_s19 = scalar_lea.vmem %s47_s25, 16  ;;  %s429_s2 = scalar_lea.vmem %s47_s25, 32 }
  0x3d   :  { %p426_p13 = scmp.ne.s32.totalorder %s47_s25, %s425_s19  ;;  %p430_p0 = scmp.lt.s32.totalorder %s47_s25, %s47_s25 }
  0x3e   :  { %p431_p1 = scmp.lt.s32.totalorder %s429_s2, %s425_s19 }
  0x40   :  { %p432_p2 = por %p431_p1, %p430_p0 }
  0x42   :  { %p433_p3 = pnand %p432_p2, %p426_p13 }
  0x44   :  { %436 = shalt.err (!%p433_p3)
}
  0x45   :  { %49 = dma.hbm_to_vmem [thread:$0]  %s624_s3, 16, %s47_s25, [#allocation8]  }
  0x46   :  { %s495_s0 = smov [#allocation12]   ;;  %s437_s26 = scalar_lea.hbm %s626_s5, 16 }
  0x47   :  { %s66_s21 = sshll.u32 %s495_s0, 4  ;;  %p438_p4 = scmp.ne.s32.totalorder %s626_s5, %s437_s26  ;;  %s67_s21 = int_to_ptr.vmem [resolvable:$true] %s66_s21 }
  0x48   :  { %p441_p5 = scmp.lt.u32.totalorder %s437_s26, %s626_s5 }
  0x4a   :  { %p443_p6 = pnand %p441_p5, %p438_p4 }
  0x4c   :  { %446 = shalt.err (!%p443_p6)
}
  0x4d   :  { %s447_s7 = scalar_lea.vmem %s67_s21, 16  ;;  %s451_s3 = scalar_lea.vmem %s67_s21, 32 }
  0x4e   :  { %p448_p7 = scmp.ne.s32.totalorder %s67_s21, %s447_s7  ;;  %p452_p8 = scmp.lt.s32.totalorder %s67_s21, %s67_s21 }
  0x4f   :  { %p453_p9 = scmp.lt.s32.totalorder %s451_s3, %s447_s7 }
  0x51   :  { %p454_p10 = por %p453_p9, %p452_p8 }
  0x53   :  { %p455_p11 = pnand %p454_p10, %p448_p7 }
  0x55   :  { %458 = shalt.err (!%p455_p11)
}
  0x56   :  { %69 = dma.hbm_to_vmem [thread:$0]  %s626_s5, 16, %s67_s21, [#allocation11]  }
  0x57   :  { %481 = dma.done.wait [#allocation5], 256  }
  0x58   :  { %482 = vsyncadd [#allocation5], 4294967040 }
  0x59   :  { %483 = dma.done.wait [#allocation8], 2064  }
  0x5a   :  { %484 = vsyncadd [#allocation8], 4294965232 }
  0x5b   :  { %485 = dma.done.wait [#allocation11], 32  }
  0x5c   :  { %486 = vsyncadd [#allocation11], 4294967264  ;;  %v89_v0 = vld [vmem:[#allocation7] sm:$0xff]  ;;  %v90_v1 = vld [vmem:[#allocation7 + $0x8] sm:$0xff]  ;;  %s496_s5 = smov [#allocation13]  }
  0x5d   :  { %v91_v2 = vld [vmem:[#allocation7 + $0x10] sm:$0xff]  ;;  %v305_v3 = vpack.c.bf16 %v90_v1, %v89_v0  ;;  %v92_v4 = vld [vmem:[#allocation7 + $0x18] sm:$0xff]  ;;  %v93_v6 = vld [vmem:[#allocation7 + $0x20] sm:$0xff]  ;;  %s235_s4 = sshll.u32 %s496_s5, 4  ;;  %s236_s4 = int_to_ptr.vmem [resolvable:$true] %s235_s4 }
  0x5e   :  { %v309_v5 = vpack.c.bf16 %v92_v4, %v91_v2  ;;  %v94_v7 = vld [vmem:[#allocation7 + $0x28] sm:$0xff]  ;;  %v85_v9 = vld [vmem:[#allocation4] sm:$0xff]  ;;  %v96_v11 = vld [vmem:[#allocation7 + $0x38] sm:$0xff]  ;;  %s459_s23 = scalar_lea.vmem %s236_s4, 256  ;;  %p464_p13 = scmp.lt.s32.totalorder %s236_s4, %s236_s4 }
  0x5f   :  { %306 = vmatprep.subr.bf16.mxu0 %v305_v3  ;;  %v313_v8 = vpack.c.bf16 %v94_v7, %v93_v6  ;;  %v95_v10 = vld [vmem:[#allocation7 + $0x30] sm:$0xff]  ;;  %302 = vmatprep.mubr.f32.mxu0 %v85_v9  ;;  %v97_v13 = vld [vmem:[#allocation7 + $0x40] sm:$0xff]  ;;  %v98_v14 = vld [vmem:[#allocation7 + $0x48] sm:$0xff]  ;;  %p460_p12 = scmp.ne.s32.totalorder %s236_s4, %s459_s23  ;;  %p465_p0 = scmp.lt.s32.totalorder %s459_s23, %s459_s23 }
  0x60   :  { %308 = vmatpush3.bf16.msra.mxu0 %v305_v3  ;;  %v317_v12 = vpack.c.bf16 %v96_v11, %v95_v10  ;;  %v321_v15 = vpack.c.bf16 %v98_v14, %v97_v13  ;;  %v99_v16 = vld [vmem:[#allocation7 + $0x50] sm:$0xff]  ;;  %v100_v17 = vld [vmem:[#allocation7 + $0x58] sm:$0xff]  ;;  %v101_v19 = vld [vmem:[#allocation7 + $0x60] sm:$0xff] }
  0x61   :  { %310 = vmatprep.subr.bf16.mxu0 %v309_v5  ;;  %v325_v18 = vpack.c.bf16 %v100_v17, %v99_v16  ;;  %v102_v20 = vld [vmem:[#allocation7 + $0x68] sm:$0xff]  ;;  %v103_v22 = vld [vmem:[#allocation7 + $0x70] sm:$0xff]  ;;  %v104_v23 = vld [vmem:[#allocation7 + $0x78] sm:$0xff]  ;;  %p466_p1 = por %p465_p0, %p464_p13 }
  0x62   :  { %v329_v21 = vpack.c.bf16 %v102_v20, %v101_v19  ;;  %v333_v24 = vpack.c.bf16 %v104_v23, %v103_v22  ;;  %v86_v25 = vld [vmem:[#allocation4 + $0x8] sm:$0xff]  ;;  %v249_v26 = vld [vmem:[#allocation9] ss:$0 sm:$0xff]  ;;  %v250_v48 = vld [vmem:[#allocation10] ss:$0 sm:$0xff] }
  0x63   :  { %v251_v50 = vld [vmem:[#allocation12] ss:$0 sm:$0xff]  ;;  %p467_p2 = pnand %p466_p1, %p460_p12 }
  0x64   :  { %312 = vmatpush3.bf16.msra.mxu0 %v309_v5 }
  0x65   :  { %314 = vmatprep.subr.bf16.mxu0 %v313_v8 }
  0x68   :  { %316 = vmatpush3.bf16.msra.mxu0 %v313_v8 }
  0x69   :  { %318 = vmatprep.subr.bf16.mxu0 %v317_v12 }
  0x6c   :  { %320 = vmatpush3.bf16.msra.mxu0 %v317_v12 }
  0x6d   :  { %322 = vmatprep.subr.bf16.mxu0 %v321_v15 }
  0x70   :  { %324 = vmatpush3.bf16.msra.mxu0 %v321_v15 }
  0x71   :  { %326 = vmatprep.subr.bf16.mxu0 %v325_v18 }
  0x74   :  { %328 = vmatpush3.bf16.msra.mxu0 %v325_v18 }
  0x75   :  { %330 = vmatprep.subr.bf16.mxu0 %v329_v21 }
  0x78   :  { %332 = vmatpush3.bf16.msra.mxu0 %v329_v21 }
  0x79   :  { %334 = vmatprep.subr.bf16.mxu0 %v333_v24 }
  0x7c   :  { %336 = vmatpush3.bf16.msra.mxu0 %v333_v24 }
  0x7f   :  { %303 = vmatmul.mubr.f32.vlgmr.msra.gmra.mrb[0].mxu0 %v86_v25 }
 0x152   :  { %v304_v27 = vpop.f32.mrb[0].mxu0 }
 0x153   :  { %v178_v28 = vpop.f32.mrb[1].mxu0  ;;  %v184_v30 = vadd.f32 %v304_v27, %v249_v26 }
 0x154   :  { %v179_v29 = vadd.f32 %v249_v26, %v178_v28 }
 0x155   :  { %v188_v32 = vadd.f32 %v184_v30, %v86_v25 }
 0x156   :  { %v187_v31 = vadd.f32 %v179_v29, %v85_v9 }
 0x158   :  { %189 = vadd.xlane.f32.xlu0 %v187_v31 }
 0x15c   :  { %191 = vadd.xlane.f32.xlu0 %v188_v32 }
 0x1e5   :  { %v190_v33 = vpop.xlane.xlu0 %189 }
 0x1e6   :  { %v194_v34 = vmul.f32 0.0078125, %v190_v33 }
 0x1e8   :  { %v196_v35 = vsub.f32 %v187_v31, %v194_v34 }
 0x1e9   :  { %v192_v36 = vpop.xlane.xlu0 %191 }
 0x1ea   :  { %v195_v37 = vmul.f32 0.0078125, %v192_v36  ;;  %v198_v38 = vmul.f32 %v196_v35, %v196_v35 }
 0x1ec   :  { %v197_v39 = vsub.f32 %v188_v32, %v195_v37  ;;  %200 = vadd.xlane.f32.xlu1 %v198_v38 }
 0x1ee   :  { %v199_v40 = vmul.f32 %v197_v39, %v197_v39 }
 0x1f0   :  { %202 = vadd.xlane.f32.xlu1 %v199_v40 }
 0x279   :  { %v201_v41 = vpop.xlane.xlu1 %200 }
 0x27a   :  { %v204_v42 = vmul.f32 0.0078125, %v201_v41 }
 0x27c   :  { %v206_v43 = vadd.f32 1e-05, %v204_v42 }
 0x27d   :  { %v203_v44 = vpop.xlane.xlu1 %202 }
 0x27e   :  { %345 = vrsqrt.f32 %v206_v43  ;;  %v205_v45 = vmul.f32 0.0078125, %v203_v44 }
 0x280   :  { %v207_v46 = vadd.f32 1e-05, %v205_v45 }
 0x282   :  { %347 = vrsqrt.f32 %v207_v46 }
 0x288   :  { %v346_v47 = vpop.eup %345 }
 0x289   :  { %v210_v49 = vmul.f32 %v346_v47, %v196_v35 }
 0x28b   :  { %v218_v51 = vmul.f32 %v250_v48, %v210_v49 }
 0x28c   :  { %v348_v52 = vpop.eup %347 }
 0x28d   :  { %v211_v53 = vmul.f32 %v348_v52, %v197_v39  ;;  %v226_v54 = vadd.f32 %v251_v50, %v218_v51 }
 0x28f   :  { %v219_v55 = vmul.f32 %v250_v48, %v211_v53  ;;  %228 = vst [vmem:[#allocation13] sm:$0xff] %v226_v54 }
 0x291   :  { %v227_v56 = vadd.f32 %v251_v50, %v219_v55 }
 0x293   :  { %229 = vst [vmem:[#allocation13 + $0x8] sm:$0xff] %v227_v56 }
 0x294   :  { %470 = shalt.err (!%p467_p2)
}
 0x295   :  { %s471_s13 = scalar_lea.hbm %s627_s6, 256 }
 0x296   :  { %p472_p3 = scmp.ne.s32.totalorder %s627_s6, %s471_s13  ;;  %p475_p4 = scmp.lt.u32.totalorder %s471_s13, %s627_s6 }
 0x298   :  { %p477_p5 = pnand %p475_p4, %p472_p3 }
 0x29a   :  { %480 = shalt.err (!%p477_p5)
}
 0x29b   :  { %241 = dma.vmem_to_hbm [thread:$0]  %s236_s4, 256, %s627_s6, [#allocation6], %s491_s8, %s491_s8, %s492_s9  }
 0x29c   :  { %487 = dma.done.wait [#allocation6], 256  }
 0x29d   :  { %488 = vsyncadd [#allocation6], 4294967040 }
 0x29e   :  { %245 = vsyncpa [#allocation5], 1 }
 0x29f   :  { %246 = vsyncpa [#allocation8], 1 }
 0x2a0   :  { %247 = vsyncpa [#allocation11], 1 }
 0x2a1   :  { %248 = vsyncpa [#allocation6], 1 }

</bundles_post_ra>
